<compile_context>
chip_gen: v6e
topology: v6e:2x2x1
jax: 0.10.0
libtpu: 0.0.40
codegen_flags: <defaults>
</compile_context>

<pallas_src>
import functools
import math

import jax
import jax.numpy as jnp
from jax.experimental import pallas as pl
from jax.experimental.pallas import tpu as pltpu


def _round_up(x, m):
    return ((x + m - 1) // m) * m


def _vmem_capacity_bytes():
    try:
        return int(pltpu.get_tpu_info().vmem_capacity_bytes)
    except Exception:
        return 64 * 2 ** 20          # conservative: v7x per-TensorCore VMEM


def _pass3_vmem_bytes(tm, tk, d, elt):
    return (2 * tm * d * elt             # anchor rows, double buffered
            + 2 * tk * d * elt           # contrast cols, double buffered
            + 8 * tm * tk * 4            # adc tile + elementwise temporaries
            + 3 * tm * 128 * 4           # per-row scratch (lane padded)
            + 2 * 8 * 128 * 4            # output partial-sum block
            + 6 * 2 * tk * 4             # col label/mod/bias strips
            + 6 * tm * 4)                # row label/scale/mmod strips


# ---------------------------------------------------------------------------
# Pass 1: fused reshape/pad + L2 normalize + 1/sqrt(T) scale + cast.
# ---------------------------------------------------------------------------
def _normalize_kernel(f_ref, o_ref, *, scale, n_valid, mask_rows):
    tm = f_ref.shape[0]
    f = f_ref[...].astype(jnp.float32)                      # (tm, D)
    sq = jnp.sum(f * f, axis=-1, keepdims=True)
    inv = jnp.float32(scale) / jnp.maximum(jnp.sqrt(sq), 1e-12)   # F.normalize eps
    out = f * inv
    if mask_rows:
        # Zero rows past N (covers both explicit padding and the undefined tail
        # of a ragged boundary input block).
        row = (pl.program_id(0) * tm
               + jax.lax.broadcasted_iota(jnp.int32, (tm, 1), 0))
        out = jnp.where(row < n_valid, out, 0.0)
    o_ref[...] = out.astype(o_ref.dtype)


# ---------------------------------------------------------------------------
# Pass 2: focal modulation (1 - p_true)^gamma, once per batch sample (row-tiled).
# ---------------------------------------------------------------------------
def _modulation_kernel(preds_ref, lbl_ref, out_ref, *, gamma):
    p = preds_ref[...].astype(jnp.float32)                  # (tb, C)
    pm = jnp.max(p, axis=-1, keepdims=True)
    lse = jnp.log(jnp.sum(jnp.exp(p - pm), axis=-1, keepdims=True))
    logprobs = p - pm - lse                                 # log_softmax
    cc = jax.lax.broadcasted_iota(jnp.int32, p.shape, 1)
    onehot = cc == lbl_ref[...]                             # (tb, C) bool
    nll = jnp.sum(jnp.where(onehot, logprobs, 0.0), axis=1, keepdims=True)
    pt = jnp.exp(nll)                                       # (tb, 1), pt <= 1
    base = jnp.maximum(1.0 - pt, 0.0)
    g = float(gamma)
    if g == float(int(g)) and 0 <= int(g) <= 8:
        mod = jnp.ones_like(base)
        for _ in range(int(g)):                             # integer power: VPU muls
            mod = mod * base
    else:
        mod = jnp.power(base, g)
    out_ref[...] = mod


# ---------------------------------------------------------------------------
# Pass 3: tiled/streamed SupCon loss (online masked logsumexp + madc only).
# ---------------------------------------------------------------------------
def _fmsupcon_tiled_kernel(frow_ref, fcol_ref, lblrow_ref, rscale_ref,
                           rmmod_ref, lblcol_ref, modcol_ref, colbias_ref,
                           out_ref, m_sc, d_sc, madc_sc,
                           *, n_valid, has_col_pad, mask_pad_rows):
    i = pl.program_id(0)            # row block ("parallel")
    k = pl.program_id(1)            # col block ("arbitrary", innermost)
    nk = pl.num_programs(1)
    tm = frow_ref.shape[0]
    tk = fcol_ref.shape[0]
    NEG = jnp.float32(-1e30)

    @pl.when(k == 0)
    def _init():
        m_sc[...] = jnp.full_like(m_sc, NEG)
        d_sc[...] = jnp.zeros_like(d_sc)
        madc_sc[...] = jnp.zeros_like(madc_sc)

    # NT-form bf16 matmul with f32 accumulation; 1/T already folded into the
    # features, so adc is already the temperature-scaled logit tile.
    adc = jax.lax.dot_general(
        frow_ref[...], fcol_ref[...],
        dimension_numbers=(((1,), (1,)), ((), ())),
        preferred_element_type=jnp.float32)                 # (tm, tk)

    lbl_eq = lblrow_ref[...] == lblcol_ref[...]             # (tm,1)==(1,tk) -> (tm,tk)
    mod = modcol_ref[...]                                   # (1, tk)

    if has_col_pad:
        adc_den = adc + colbias_ref[...]                    # -1e30 on padded cols
    else:
        adc_den = adc

    def accumulate(adc_masked, pos_mask):
        # online masked softmax denominator (shift-stable)
        m_prev = m_sc[...]
        blk_max = jnp.max(adc_masked, axis=1, keepdims=True)
        m_new = jnp.maximum(m_prev, blk_max)
        p = jnp.exp(adc_masked - m_new)                     # masked cols underflow to 0
        d_sc[...] = (jnp.exp(m_prev - m_new) * d_sc[...]
                     + jnp.sum(p, axis=1, keepdims=True))
        m_sc[...] = m_new
        # modulated positive-pair sum (independent of the max shift)
        wmod = jnp.where(pos_mask, mod, 0.0)                # mask[i,j] * modulation[j]
        madc_sc[...] += jnp.sum(wmod * adc, axis=1, keepdims=True)

    row_lo = i * tm
    col_lo = k * tk
    touches_diag = jnp.logical_and(row_lo < col_lo + tk, col_lo < row_lo + tm)

    @pl.when(touches_diag)
    def _diag_tile():
        rg = row_lo + jax.lax.broadcasted_iota(jnp.int32, (tm, tk), 0)
        cg = col_lo + jax.lax.broadcasted_iota(jnp.int32, (tm, tk), 1)
        diag = rg == cg
        accumulate(jnp.where(diag, NEG, adc_den),
                   jnp.logical_and(lbl_eq, jnp.logical_not(diag)))

    @pl.when(jnp.logical_not(touches_diag))
    def _off_diag_tile():
        accumulate(adc_den, lbl_eq)

    @pl.when(k == nk - 1)
    def _finalize():
        lse = m_sc[...] + jnp.log(d_sc[...])                # masked logsumexp per row
        # rscale = -(T/Tb)/max(pos_count,1); rmmod = sum_j mask*mod (both hoisted).
        loss_row = rscale_ref[...] * (madc_sc[...] - lse * rmmod_ref[...])
        if mask_pad_rows:
            rows = row_lo + jax.lax.broadcasted_iota(jnp.int32, (tm, 1), 0)
            loss_row = jnp.where(rows < n_valid, loss_row, 0.0)
        blk = jnp.sum(loss_row, axis=0, keepdims=True)      # (1, 1) block partial sum
        out_ref[...] = jnp.broadcast_to(blk, out_ref.shape)


# ---------------------------------------------------------------------------
# Jitted core.
# ---------------------------------------------------------------------------
@functools.partial(jax.jit, static_argnames=(
    "supcon", "temperature", "base_temperature", "gamma",
    "tm", "tk", "n_pad", "tm1", "tb2", "vmem_limit", "matmul_dtype"))
def _fm_supcon_core(features, preds, labels, *, supcon, temperature,
                    base_temperature, gamma, tm, tk, n_pad, tm1, tb2,
                    vmem_limit, matmul_dtype):
    B, V, D = features.shape
    C = preds.shape[1]
    N = B * V
    pad = n_pad - N
    num_i = n_pad // tm
    num_k = n_pad // tk

    # ---- Pass 1: normalize (+1/sqrt(T)) + cast, pad fused (ragged blocks) ----
    feat2d = features.reshape(N, D)                         # batch-major, free view
    in_last_blk = max((N - 1) // tm1, 0)
    f_norm = pl.pallas_call(
        functools.partial(_normalize_kernel,
                          scale=1.0 / math.sqrt(temperature),
                          n_valid=N,
                          mask_rows=(pad > 0) or (N % tm1 != 0)),
        out_shape=jax.ShapeDtypeStruct((n_pad, D), matmul_dtype),
        grid_spec=pltpu.PrefetchScalarGridSpec(
            num_scalar_prefetch=0,
            grid=(n_pad // tm1,),
            in_specs=[pl.BlockSpec(
                (tm1, D), lambda i: (jnp.minimum(i, in_last_blk), 0))],
            out_specs=pl.BlockSpec((tm1, D), lambda i: (i, 0))),
        compiler_params=pltpu.CompilerParams(
            dimension_semantics=("parallel",)),
    )(feat2d)

    # ---- Pass 2: focal modulation per batch sample (row-tiled) ----
    mod_b = pl.pallas_call(
        functools.partial(_modulation_kernel, gamma=float(gamma)),
        out_shape=jax.ShapeDtypeStruct((B, 1), jnp.float32),
        grid_spec=pltpu.PrefetchScalarGridSpec(
            num_scalar_prefetch=0,
            grid=(pl.cdiv(B, tb2),),
            in_specs=[pl.BlockSpec((tb2, C), lambda i: (i, 0)),
                      pl.BlockSpec((tb2, 1), lambda i: (i, 0))],
            out_specs=pl.BlockSpec((tb2, 1), lambda i: (i, 0))),
        compiler_params=pltpu.CompilerParams(
            dimension_semantics=("parallel",)),
    )(preds.astype(jnp.float32), labels.astype(jnp.int32).reshape(B, 1))[:, 0]

    # ---- Hoisted per-row quantities (O(B^2) segment sums, outside the kernel) ----
    mask_lbl_b = (labels.astype(jnp.int32) if supcon
                  else jnp.arange(B, dtype=jnp.int32))
    same = mask_lbl_b[:, None] == mask_lbl_b[None, :]                # (B, B)
    cnt_b = jnp.sum(same.astype(jnp.float32), axis=1)
    modsum_b = jnp.sum(jnp.where(same, mod_b[None, :], 0.0), axis=1)
    cnt_row_b = V * cnt_b - 1.0                  # positives per row (diag excluded)
    mmod_row_b = V * modsum_b - mod_b            # sum_j mask[i,j]*mod[j]

    def _rows(x_b, pad_val=0.0, dtype=jnp.float32):
        x = jnp.repeat(x_b.astype(dtype), V)                # batch-major row layout
        return jnp.pad(x, (0, pad), constant_values=pad_val)

    lbl_rows = _rows(mask_lbl_b, pad_val=-1, dtype=jnp.int32)
    mod_cols = _rows(mod_b)
    # NOTE: rows with zero positives get a clamped denominator (loss 0) instead
    # of the torch reference's NaN; padded rows are masked out below anyway.
    row_scale = (-(temperature / base_temperature)
                 / jnp.maximum(_rows(cnt_row_b), 1.0))
    row_mmod = _rows(mmod_row_b)
    col_bias = jnp.where(jnp.arange(n_pad) < N, 0.0, -1e30).astype(jnp.float32)

    lbl_row_arr = lbl_rows.reshape(n_pad, 1)
    lbl_col_arr = lbl_rows.reshape(1, n_pad)
    mod_col_arr = mod_cols.reshape(1, n_pad)
    bias_col_arr = col_bias.reshape(1, n_pad)
    row_scale_arr = row_scale.reshape(n_pad, 1)
    row_mmod_arr = row_mmod.reshape(n_pad, 1)

    cost = pl.CostEstimate(
        flops=int(2 * n_pad * n_pad * D + 8 * n_pad * n_pad),
        transcendentals=int(n_pad * n_pad),
        bytes_accessed=int((num_i + 1) * n_pad * D
                           * jnp.dtype(matmul_dtype).itemsize
                           + 8 * n_pad * 4 + num_i * 8 * 128 * 4))

    kernel = functools.partial(
        _fmsupcon_tiled_kernel,
        n_valid=N, has_col_pad=(pad > 0), mask_pad_rows=(pad > 0))

    out = pl.pallas_call(
        kernel,
        out_shape=jax.ShapeDtypeStruct((num_i * 8, 128), jnp.float32),
        grid_spec=pltpu.PrefetchScalarGridSpec(
            num_scalar_prefetch=0,
            grid=(num_i, num_k),
            in_specs=[
                pl.BlockSpec((tm, D), lambda i, k: (i, 0)),   # anchor rows
                pl.BlockSpec((tk, D), lambda i, k: (k, 0)),   # contrast cols
                pl.BlockSpec((tm, 1), lambda i, k: (i, 0)),   # row mask-labels
                pl.BlockSpec((tm, 1), lambda i, k: (i, 0)),   # row scale
                pl.BlockSpec((tm, 1), lambda i, k: (i, 0)),   # row sum(mask*mod)
                pl.BlockSpec((1, tk), lambda i, k: (0, k)),   # col mask-labels
                pl.BlockSpec((1, tk), lambda i, k: (0, k)),   # col modulation
                pl.BlockSpec((1, tk), lambda i, k: (0, k)),   # col validity bias
            ],
            out_specs=pl.BlockSpec((8, 128), lambda i, k: (i, 0)),
            scratch_shapes=[pltpu.VMEM((tm, 1), jnp.float32)] * 3),
        compiler_params=pltpu.CompilerParams(
            dimension_semantics=("parallel", "arbitrary"),
            vmem_limit_bytes=vmem_limit),
        cost_estimate=cost,
    )(f_norm, f_norm, lbl_row_arr, row_scale_arr, row_mmod_arr,
      lbl_col_arr, mod_col_arr, bias_col_arr)

    total = jnp.sum(out.reshape(num_i, 8, 128)[:, 0, 0])
    return total / jnp.float32(N)


# ---------------------------------------------------------------------------
# Public wrapper: generation-aware tile / VMEM selection, then the jitted core.
# ---------------------------------------------------------------------------
def focally_modulated_supcon_loss(features, preds, labels, *, supcon=True,
                                  temperature=0.07, base_temperature=0.07,
                                  gamma=2.0, block_rows=None, block_cols=None,
                                  matmul_dtype=jnp.bfloat16):
    """features: (B, V, ...) f32; preds: (B, C) f32; labels: (B,) int32."""
    # TODO(synk): preds2 (teacher/student modulation), alpha class weighting
    # (references undefined `input` in the torch source) and the detach flag
    # (autograd-only) are not implemented; norm_ind is numerically identical
    # to the default per-row normalization and needs no special path.
    if base_temperature is None:
        base_temperature = temperature
    if features.ndim > 3:
        features = features.reshape(features.shape[0], features.shape[1], -1)
    if features.ndim != 3:
        raise ValueError("`features` must be [bsz, n_views, ...]")

    B, V, D = features.shape
    N = B * V
    C = preds.shape[-1]
    elt = jnp.dtype(matmul_dtype).itemsize

    vmem_cap = _vmem_capacity_bytes()

    # ---- Pass-3 tile sizes (generation aware: grow tm as far as VMEM allows) ----
    if block_rows is not None and block_cols is not None:
        tm, tk = int(block_rows), int(block_cols)
    elif N <= 512:
        tm = tk = _round_up(max(N, 8), 8)
    else:
        tk = 512
        budget = int(0.70 * vmem_cap)
        tm = 256
        for cand in (1024, 512, 256):
            if _pass3_vmem_bytes(cand, tk, D, elt) <= budget:
                tm = cand
                break
    lcm = tm * tk // math.gcd(tm, tk)
    n_pad = _round_up(max(N, 8), lcm)
    assert n_pad % tm == 0 and n_pad % tk == 0
    assert tm % 8 == 0
    assert tk % 128 == 0 or tk == n_pad

    est = _pass3_vmem_bytes(tm, tk, D, elt)
    vmem_limit = int(min(max(2 * est, 32 * 2 ** 20), 0.72 * vmem_cap))
    vmem_limit = max(vmem_limit, int(1.2 * est))

    # Pass-1 row tile (divides tm hence n_pad); keep its block bytes modest.
    tm1 = tm
    while tm1 % 16 == 0 and tm1 > 8 and 12 * tm1 * D > (8 * 2 ** 20):
        tm1 //= 2
    # Pass-2 row tile.
    tb2 = min(256, _round_up(B, 8))
    while tb2 % 16 == 0 and tb2 > 8 and 16 * tb2 * C > (8 * 2 ** 20):
        tb2 //= 2

    return _fm_supcon_core(
        features, preds, labels,
        supcon=bool(supcon), temperature=float(temperature),
        base_temperature=float(base_temperature), gamma=float(gamma),
        tm=tm, tk=tk, n_pad=n_pad, tm1=tm1, tb2=tb2,
        vmem_limit=vmem_limit, matmul_dtype=matmul_dtype)


# ---------------------------------------------------------------------------
# Pure-JAX mirror of the torch forward (preds2=None, alpha=None) for checking.
# ---------------------------------------------------------------------------
def _reference(features, preds, labels, *, supcon=True, temperature=0.07,
               base_temperature=0.07, gamma=2.0, matmul_dtype=jnp.float32):
    B, V, D = features.shape
    N = B * V
    f = features.astype(jnp.float32)
    denom = jnp.maximum(jnp.sqrt(jnp.sum(f * f, axis=2, keepdims=True)), 1e-12)
    if matmul_dtype == jnp.bfloat16:
        # mirror the kernel's cast point (1/sqrt(T) folded before the bf16 cast)
        cf = (f * ((1.0 / math.sqrt(temperature)) / denom)).astype(jnp.bfloat16)
        cf = jnp.transpose(cf, (1, 0, 2)).reshape(N, D)
        adc = jnp.dot(cf, cf.T, preferred_element_type=jnp.float32)
    else:
        cf = jnp.transpose(f / denom, (1, 0, 2)).reshape(N, D)
        adc = jnp.dot(cf, cf.T, preferred_element_type=jnp.float32) / temperature

    preds_rep = jnp.tile(preds, (V, 1))
    logprobs = jax.nn.log_softmax(preds_rep, axis=-1)
    labels_rep = jnp.tile(labels, (V,))
    nll = jnp.take_along_axis(logprobs, labels_rep[:, None], axis=-1)[:, 0]
    pt = jnp.exp(nll)
    modulation = (1.0 - pt) ** gamma

    if supcon:
        m = (labels[:, None] == labels[None, :]).astype(jnp.float32)
    else:
        m = jnp.eye(B, dtype=jnp.float32)
    mask = jnp.tile(m, (V, V))

    logits = adc - jnp.max(adc, axis=1, keepdims=True)
    logits_mask = 1.0 - jnp.eye(N, dtype=jnp.float32)
    mask = mask * logits_mask
    exp_logits = jnp.exp(logits) * logits_mask
    log_prob = logits - jnp.log(jnp.sum(exp_logits, axis=1, keepdims=True))
    log_prob = modulation[None, :] * log_prob               # torch broadcast (per column)
    mlpp = jnp.sum(mask * log_prob, axis=1) / jnp.sum(mask, axis=1)
    loss = -(temperature / base_temperature) * mlpp
    return jnp.mean(loss)


if __name__ == "__main__":
    # ---- Test 1: small single-tile problem ----
    B, V, D, C = 8, 2, 32, 16
    k1, k2, k3 = jax.random.split(jax.random.PRNGKey(0), 3)
    features = jax.random.normal(k1, (B, V, D), dtype=jnp.float32)
    preds = jax.random.normal(k2, (B, C), dtype=jnp.float32)
    labels = jax.random.randint(k3, (B,), 0, 4, dtype=jnp.int32)

    loss = jax.block_until_ready(
        focally_modulated_supcon_loss(features, preds, labels, supcon=True))
    ref_bf = _reference(features, preds, labels, supcon=True,
                        matmul_dtype=jnp.bfloat16)
    ref_f32 = _reference(features, preds, labels, supcon=True)
    assert jnp.allclose(loss, ref_bf, atol=3e-3, rtol=3e-3), (loss, ref_bf)
    assert jnp.allclose(loss, ref_f32, atol=5e-2, rtol=5e-2), (loss, ref_f32)

    # ---- Test 1b: supcon=False path (eye mask / hoisted V-1 positive count) ----
    loss_e = jax.block_until_ready(
        focally_modulated_supcon_loss(features, preds, labels, supcon=False))
    ref_e = _reference(features, preds, labels, supcon=False,
                       matmul_dtype=jnp.bfloat16)
    assert jnp.allclose(loss_e, ref_e, atol=3e-3, rtol=3e-3), (loss_e, ref_e)

    # ---- Test 2: multi-block streamed path (padding + ragged pass-1 blocks
    #              + online LSE + diagonal / off-diagonal tile branches) ----
    B2, V2, D2, C2 = 130, 2, 32, 16
    k4, k5, k6 = jax.random.split(jax.random.PRNGKey(1), 3)
    f2 = jax.random.normal(k4, (B2, V2, D2), dtype=jnp.float32)
    p2 = jax.random.normal(k5, (B2, C2), dtype=jnp.float32)
    l2 = jax.random.randint(k6, (B2,), 0, 5, dtype=jnp.int32)
    loss2 = jax.block_until_ready(
        focally_modulated_supcon_loss(f2, p2, l2, supcon=True,
                                      block_rows=128, block_cols=128))
    ref2_bf = _reference(f2, p2, l2, supcon=True, matmul_dtype=jnp.bfloat16)
    ref2_f32 = _reference(f2, p2, l2, supcon=True)
    assert jnp.allclose(loss2, ref2_bf, atol=3e-3, rtol=3e-3), (loss2, ref2_bf)
    assert jnp.allclose(loss2, ref2_f32, atol=5e-2, rtol=5e-2), (loss2, ref2_f32)

    print("KERNEL_OK")
</pallas_src>

<mosaic_0001>
module attributes {stable_mosaic.version = 11 : i64} {
  func.func @_normalize_kernel(%arg0: i32, %arg1: memref<16x32xf32, #tpu.memory_space<vmem>>, %arg2: memref<16x32xbf16, #tpu.memory_space<vmem>>) attributes {dimension_semantics = [#tpu.dimension_semantics<parallel>], iteration_bounds = array<i64: 1>, scalar_prefetch = 0 : i64, scratch_operands = 0 : i64, tpu.core_type = #tpu.core_type<tc>, window_params = [{transform_indices = @transform_0, window_bounds = array<i64: 16, 32>}, {transform_indices = @transform_1, window_bounds = array<i64: 16, 32>}]} {
    %c0 = arith.constant 0 : index
    %c0_0 = arith.constant 0 : index
    %0 = vector.load %arg1[%c0, %c0_0] : memref<16x32xf32, #tpu.memory_space<vmem>>, vector<16x32xf32>
    %1 = arith.mulf %0, %0 : vector<16x32xf32>
    %cst = arith.constant dense<0.000000e+00> : vector<16xf32>
    %2 = vector.multi_reduction <add>, %1, %cst [1] : vector<16x32xf32> to vector<16xf32>
    %3 = vector.shape_cast %2 : vector<16xf32> to vector<16x1xf32>
    %4 = math.sqrt %3 : vector<16x1xf32>
    %cst_1 = arith.constant 9.99999996E-13 : f32
    %5 = vector.broadcast %cst_1 : f32 to vector<16x1xf32>
    %6 = arith.maximumf %4, %5 : vector<16x1xf32>
    %cst_2 = arith.constant 3.77964473 : f32
    %7 = vector.broadcast %cst_2 : f32 to vector<16x1xf32>
    %8 = arith.divf %7, %6 : vector<16x1xf32>
    %9 = vector.broadcast %8 : vector<16x1xf32> to vector<16x32xf32>
    %10 = arith.mulf %0, %9 : vector<16x32xf32>
    %11 = arith.truncf %10 : vector<16x32xf32> to vector<16x32xbf16>
    %c0_3 = arith.constant 0 : index
    %c0_4 = arith.constant 0 : index
    %12 = vector.load %arg2[%c0_3, %c0_4] : memref<16x32xbf16, #tpu.memory_space<vmem>>, vector<16x32xbf16>
    tpu.vector_store %arg2[%c0_3, %c0_4], %11 {strides = array<i32>} : memref<16x32xbf16, #tpu.memory_space<vmem>>, vector<16x32xbf16>,
    return
  }
  func.func @transform_0(%arg0: i32) -> (i32, i32) {
    %c0_i32 = arith.constant 0 : i32
    %0 = arith.minsi %arg0, %c0_i32 : i32
    %c0_i32_0 = arith.constant 0 : i32
    %c0_i32_1 = arith.constant 0 : i32
    return %0, %c0_i32_0 : i32, i32
  }
  func.func @transform_1(%arg0: i32) -> (i32, i32) {
    %c0_i32 = arith.constant 0 : i32
    %c0_i32_0 = arith.constant 0 : i32
    return %arg0, %c0_i32 : i32, i32
  }
}

module attributes {stable_mosaic.version = 11 : i64} {
  func.func @_modulation_kernel(%arg0: i32, %arg1: memref<8x16xf32, #tpu.memory_space<vmem>>, %arg2: memref<8x1xi32, #tpu.memory_space<vmem>>, %arg3: memref<8x1xf32, #tpu.memory_space<vmem>>) attributes {dimension_semantics = [#tpu.dimension_semantics<parallel>], iteration_bounds = array<i64: 1>, scalar_prefetch = 0 : i64, scratch_operands = 0 : i64, tpu.core_type = #tpu.core_type<tc>, window_params = [{transform_indices = @transform_0, window_bounds = array<i64: 8, 16>}, {transform_indices = @transform_1, window_bounds = array<i64: 8, 1>}, {transform_indices = @transform_2, window_bounds = array<i64: 8, 1>}]} {
    %c0 = arith.constant 0 : index
    %c0_0 = arith.constant 0 : index
    %0 = vector.load %arg1[%c0, %c0_0] : memref<8x16xf32, #tpu.memory_space<vmem>>, vector<8x16xf32>
    %cst = arith.constant dense<0xFF800000> : vector<8xf32>
    %1 = vector.multi_reduction <maximumf>, %0, %cst [1] : vector<8x16xf32> to vector<8xf32>
    %2 = vector.shape_cast %1 : vector<8xf32> to vector<8x1xf32>
    %3 = vector.broadcast %2 : vector<8x1xf32> to vector<8x16xf32>
    %4 = arith.subf %0, %3 : vector<8x16xf32>
    %5 = math.exp %4 : vector<8x16xf32>
    %cst_1 = arith.constant dense<0.000000e+00> : vector<8xf32>
    %6 = vector.multi_reduction <add>, %5, %cst_1 [1] : vector<8x16xf32> to vector<8xf32>
    %7 = vector.shape_cast %6 : vector<8xf32> to vector<8x1xf32>
    %8 = math.log %7 : vector<8x1xf32>
    %9 = vector.broadcast %2 : vector<8x1xf32> to vector<8x16xf32>
    %10 = arith.subf %0, %9 : vector<8x16xf32>
    %11 = vector.broadcast %8 : vector<8x1xf32> to vector<8x16xf32>
    %12 = arith.subf %10, %11 : vector<8x16xf32>
    %13 = tpu.iota {dimensions = array<i32: 1>} : vector<8x16xi32>
    %c0_2 = arith.constant 0 : index
    %c0_3 = arith.constant 0 : index
    %14 = vector.load %arg2[%c0_2, %c0_3] : memref<8x1xi32, #tpu.memory_space<vmem>>, vector<8x1xi32>
    %15 = vector.broadcast %14 : vector<8x1xi32> to vector<8x16xi32>
    %16 = arith.cmpi eq, %13, %15 : vector<8x16xi32>
    %cst_4 = arith.constant 0.000000e+00 : f32
    %17 = vector.broadcast %cst_4 : f32 to vector<8x16xf32>
    %18 = arith.select %16, %12, %17 : vector<8x16xi1>, vector<8x16xf32>
    %cst_5 = arith.constant dense<0.000000e+00> : vector<8xf32>
    %19 = vector.multi_reduction <add>, %18, %cst_5 [1] : vector<8x16xf32> to vector<8xf32>
    %20 = vector.shape_cast %19 : vector<8xf32> to vector<8x1xf32>
    %21 = math.exp %20 : vector<8x1xf32>
    %cst_6 = arith.constant 1.000000e+00 : f32
    %22 = vector.broadcast %cst_6 : f32 to vector<8x1xf32>
    %23 = arith.subf %22, %21 : vector<8x1xf32>
    %cst_7 = arith.constant 0.000000e+00 : f32
    %24 = vector.broadcast %cst_7 : f32 to vector<8x1xf32>
    %25 = arith.maximumf %23, %24 : vector<8x1xf32>
    %cst_8 = arith.constant 1.000000e+00 : f32
    %26 = vector.broadcast %cst_8 : f32 to vector<8x1xf32>
    %27 = arith.mulf %26, %25 : vector<8x1xf32>
    %28 = arith.mulf %27, %25 : vector<8x1xf32>
    %c0_9 = arith.constant 0 : index
    %c0_10 = arith.constant 0 : index
    %29 = vector.load %arg3[%c0_9, %c0_10] : memref<8x1xf32, #tpu.memory_space<vmem>>, vector<8x1xf32>
    tpu.vector_store %arg3[%c0_9, %c0_10], %28 {strides = array<i32>} : memref<8x1xf32, #tpu.memory_space<vmem>>, vector<8x1xf32>,
    return
  }
  func.func @transform_0(%arg0: i32) -> (i32, i32) {
    %c0_i32 = arith.constant 0 : i32
    %c0_i32_0 = arith.constant 0 : i32
    return %arg0, %c0_i32 : i32, i32
  }
  func.func @transform_1(%arg0: i32) -> (i32, i32) {
    %c0_i32 = arith.constant 0 : i32
    %c0_i32_0 = arith.constant 0 : i32
    return %arg0, %c0_i32 : i32, i32
  }
  func.func @transform_2(%arg0: i32) -> (i32, i32) {
    %c0_i32 = arith.constant 0 : i32
    %c0_i32_0 = arith.constant 0 : i32
    return %arg0, %c0_i32 : i32, i32
  }
}

module attributes {stable_mosaic.version = 11 : i64} {
  func.func @_fmsupcon_tiled_kernel(%arg0: i32, %arg1: i32, %arg2: memref<16x32xbf16, #tpu.memory_space<vmem>>, %arg3: memref<16x32xbf16, #tpu.memory_space<vmem>>, %arg4: memref<16x1xi32, #tpu.memory_space<vmem>>, %arg5: memref<16x1xf32, #tpu.memory_space<vmem>>, %arg6: memref<16x1xf32, #tpu.memory_space<vmem>>, %arg7: memref<1x16xi32, #tpu.memory_space<vmem>>, %arg8: memref<1x16xf32, #tpu.memory_space<vmem>>, %arg9: memref<1x16xf32, #tpu.memory_space<vmem>>, %arg10: memref<8x128xf32, #tpu.memory_space<vmem>>, %arg11: memref<16x1xf32, #tpu.memory_space<vmem>>, %arg12: memref<16x1xf32, #tpu.memory_space<vmem>>, %arg13: memref<16x1xf32, #tpu.memory_space<vmem>>) attributes {dimension_semantics = [#tpu.dimension_semantics<parallel>, #tpu.dimension_semantics<arbitrary>], iteration_bounds = array<i64: 1, 1>, scalar_prefetch = 0 : i64, scratch_operands = 3 : i64, tpu.core_type = #tpu.core_type<tc>, window_params = [{transform_indices = @transform_0, window_bounds = array<i64: 16, 32>}, {transform_indices = @transform_1, window_bounds = array<i64: 16, 32>}, {transform_indices = @transform_2, window_bounds = array<i64: 16, 1>}, {transform_indices = @transform_3, window_bounds = array<i64: 16, 1>}, {transform_indices = @transform_4, window_bounds = array<i64: 16, 1>}, {transform_indices = @transform_5, window_bounds = array<i64: 1, 16>}, {transform_indices = @transform_6, window_bounds = array<i64: 1, 16>}, {transform_indices = @transform_7, window_bounds = array<i64: 1, 16>}, {transform_indices = @transform_8, window_bounds = array<i64: 8, 128>}]} {
    %c0_i32 = arith.constant 0 : i32
    %0 = arith.cmpi eq, %arg1, %c0_i32 : i32
    %1 = arith.extui %0 : i1 to i32
    %cst = arith.constant -1.000000e+30 : f32
    %c0_i32_0 = arith.constant 0 : i32
    %2 = arith.cmpi ne, %1, %c0_i32_0 : i32
    scf.if %2 {
      %27 = vector.broadcast %cst : f32 to vector<16x1xf32>
      %c0_19 = arith.constant 0 : index
      %c0_20 = arith.constant 0 : index
      %28 = vector.load %arg11[%c0_19, %c0_20] : memref<16x1xf32, #tpu.memory_space<vmem>>, vector<16x1xf32>
      tpu.vector_store %arg11[%c0_19, %c0_20], %27 {strides = array<i32>} : memref<16x1xf32, #tpu.memory_space<vmem>>, vector<16x1xf32>,
      %cst_21 = arith.constant 0.000000e+00 : f32
      %29 = vector.broadcast %cst_21 : f32 to vector<16x1xf32>
      %c0_22 = arith.constant 0 : index
      %c0_23 = arith.constant 0 : index
      %30 = vector.load %arg12[%c0_22, %c0_23] : memref<16x1xf32, #tpu.memory_space<vmem>>, vector<16x1xf32>
      tpu.vector_store %arg12[%c0_22, %c0_23], %29 {strides = array<i32>} : memref<16x1xf32, #tpu.memory_space<vmem>>, vector<16x1xf32>,
      %cst_24 = arith.constant 0.000000e+00 : f32
      %31 = vector.broadcast %cst_24 : f32 to vector<16x1xf32>
      %c0_25 = arith.constant 0 : index
      %c0_26 = arith.constant 0 : index
      %32 = vector.load %arg13[%c0_25, %c0_26] : memref<16x1xf32, #tpu.memory_space<vmem>>, vector<16x1xf32>
      tpu.vector_store %arg13[%c0_25, %c0_26], %31 {strides = array<i32>} : memref<16x1xf32, #tpu.memory_space<vmem>>, vector<16x1xf32>,
    } else {
    }
    %c0 = arith.constant 0 : index
    %c0_1 = arith.constant 0 : index
    %3 = vector.load %arg2[%c0, %c0_1] : memref<16x32xbf16, #tpu.memory_space<vmem>>, vector<16x32xbf16>
    %c0_2 = arith.constant 0 : index
    %c0_3 = arith.constant 0 : index
    %4 = vector.load %arg3[%c0_2, %c0_3] : memref<16x32xbf16, #tpu.memory_space<vmem>>, vector<16x32xbf16>
    %cst_4 = arith.constant dense<0.000000e+00> : vector<16x16xf32>
    %5 = tpu.matmul %3, %4, %cst_4 {dimension_numbers = #tpu.dot_dimension_numbers<[1], [1], [0], [0], [0, 0, 1, 0], [], []>} : vector<16x32xbf16>, vector<16x32xbf16>, vector<16x16xf32> -> vector<16x16xf32>
    %c0_5 = arith.constant 0 : index
    %c0_6 = arith.constant 0 : index
    %6 = vector.load %arg4[%c0_5, %c0_6] : memref<16x1xi32, #tpu.memory_space<vmem>>, vector<16x1xi32>
    %c0_7 = arith.constant 0 : index
    %c0_8 = arith.constant 0 : index
    %7 = vector.load %arg7[%c0_7, %c0_8] : memref<1x16xi32, #tpu.memory_space<vmem>>, vector<1x16xi32>
    %8 = vector.broadcast %6 : vector<16x1xi32> to vector<16x16xi32>
    %9 = vector.broadcast %7 : vector<1x16xi32> to vector<16x16xi32>
    %10 = arith.cmpi eq, %8, %9 : vector<16x16xi32>
    %c0_9 = arith.constant 0 : index
    %c0_10 = arith.constant 0 : index
    %11 = vector.load %arg8[%c0_9, %c0_10] : memref<1x16xf32, #tpu.memory_space<vmem>>, vector<1x16xf32>
    %c16_i32 = arith.constant 16 : i32
    %12 = arith.muli %arg0, %c16_i32 : i32
    %c16_i32_11 = arith.constant 16 : i32
    %13 = arith.muli %arg1, %c16_i32_11 : i32
    %c16_i32_12 = arith.constant 16 : i32
    %14 = arith.addi %13, %c16_i32_12 : i32
    %15 = arith.cmpi slt, %12, %14 : i32
    %c16_i32_13 = arith.constant 16 : i32
    %16 = arith.addi %12, %c16_i32_13 : i32
    %17 = arith.cmpi slt, %13, %16 : i32
    %18 = arith.andi %15, %17 : i1
    %19 = arith.extui %18 : i1 to i32
    %cst_14 = arith.constant -1.000000e+30 : f32
    %c0_i32_15 = arith.constant 0 : i32
    %20 = arith.cmpi ne, %19, %c0_i32_15 : i32
    scf.if %20 {
      %27 = tpu.iota {dimensions = array<i32: 0>} : vector<16x16xi32>
      %28 = vector.broadcast %12 : i32 to vector<16x16xi32>
      %29 = arith.addi %28, %27 : vector<16x16xi32>
      %30 = tpu.iota {dimensions = array<i32: 1>} : vector<16x16xi32>
      %31 = vector.broadcast %13 : i32 to vector<16x16xi32>
      %32 = arith.addi %31, %30 : vector<16x16xi32>
      %33 = arith.cmpi eq, %29, %32 : vector<16x16xi32>
      %34 = vector.broadcast %cst_14 : f32 to vector<16x16xf32>
      %35 = arith.select %33, %34, %5 : vector<16x16xi1>, vector<16x16xf32>
      %cst_19 = arith.constant dense<true> : vector<16x16xi1>
      %36 = arith.xori %33, %cst_19 : vector<16x16xi1>
      %37 = arith.andi %10, %36 : vector<16x16xi1>
      %c0_20 = arith.constant 0 : index
      %c0_21 = arith.constant 0 : index
      %38 = vector.load %arg11[%c0_20, %c0_21] : memref<16x1xf32, #tpu.memory_space<vmem>>, vector<16x1xf32>
      %cst_22 = arith.constant dense<0xFF800000> : vector<16xf32>
      %39 = vector.multi_reduction <maximumf>, %35, %cst_22 [1] : vector<16x16xf32> to vector<16xf32>
      %40 = vector.shape_cast %39 : vector<16xf32> to vector<16x1xf32>
      %41 = arith.maximumf %38, %40 : vector<16x1xf32>
      %42 = vector.broadcast %41 : vector<16x1xf32> to vector<16x16xf32>
      %43 = arith.subf %35, %42 : vector<16x16xf32>
      %44 = math.exp %43 : vector<16x16xf32>
      %45 = arith.subf %38, %41 : vector<16x1xf32>
      %46 = math.exp %45 : vector<16x1xf32>
      %c0_23 = arith.constant 0 : index
      %c0_24 = arith.constant 0 : index
      %47 = vector.load %arg12[%c0_23, %c0_24] : memref<16x1xf32, #tpu.memory_space<vmem>>, vector<16x1xf32>
      %48 = arith.mulf %46, %47 : vector<16x1xf32>
      %cst_25 = arith.constant dense<0.000000e+00> : vector<16xf32>
      %49 = vector.multi_reduction <add>, %44, %cst_25 [1] : vector<16x16xf32> to vector<16xf32>
      %50 = vector.shape_cast %49 : vector<16xf32> to vector<16x1xf32>
      %51 = arith.addf %48, %50 : vector<16x1xf32>
      %c0_26 = arith.constant 0 : index
      %c0_27 = arith.constant 0 : index
      %52 = vector.load %arg12[%c0_26, %c0_27] : memref<16x1xf32, #tpu.memory_space<vmem>>, vector<16x1xf32>
      tpu.vector_store %arg12[%c0_26, %c0_27], %51 {strides = array<i32>} : memref<16x1xf32, #tpu.memory_space<vmem>>, vector<16x1xf32>,
      %c0_28 = arith.constant 0 : index
      %c0_29 = arith.constant 0 : index
      %53 = vector.load %arg11[%c0_28, %c0_29] : memref<16x1xf32, #tpu.memory_space<vmem>>, vector<16x1xf32>
      tpu.vector_store %arg11[%c0_28, %c0_29], %41 {strides = array<i32>} : memref<16x1xf32, #tpu.memory_space<vmem>>, vector<16x1xf32>,
      %cst_30 = arith.constant 0.000000e+00 : f32
      %54 = vector.shape_cast %11 : vector<1x16xf32> to vector<1x16xf32>
      %55 = vector.broadcast %54 : vector<1x16xf32> to vector<16x16xf32>
      %56 = vector.broadcast %cst_30 : f32 to vector<16x16xf32>
      %57 = arith.select %37, %55, %56 : vector<16x16xi1>, vector<16x16xf32>
      %c0_31 = arith.constant 0 : index
      %c0_32 = arith.constant 0 : index
      %58 = vector.load %arg13[%c0_31, %c0_32] : memref<16x1xf32, #tpu.memory_space<vmem>>, vector<16x1xf32>
      %59 = arith.mulf %57, %5 : vector<16x16xf32>
      %cst_33 = arith.constant dense<0.000000e+00> : vector<16xf32>
      %60 = vector.multi_reduction <add>, %59, %cst_33 [1] : vector<16x16xf32> to vector<16xf32>
      %61 = vector.shape_cast %60 : vector<16xf32> to vector<16x1xf32>
      %62 = arith.addf %58, %61 : vector<16x1xf32>
      %c0_34 = arith.constant 0 : index
      %c0_35 = arith.constant 0 : index
      %63 = vector.load %arg13[%c0_34, %c0_35] : memref<16x1xf32, #tpu.memory_space<vmem>>, vector<16x1xf32>
      tpu.vector_store %arg13[%c0_34, %c0_35], %62 {strides = array<i32>} : memref<16x1xf32, #tpu.memory_space<vmem>>, vector<16x1xf32>,
    } else {
    }
    %true = arith.constant true
    %21 = arith.xori %18, %true : i1
    %22 = arith.extui %21 : i1 to i32
    %c0_i32_16 = arith.constant 0 : i32
    %23 = arith.cmpi ne, %22, %c0_i32_16 : i32
    scf.if %23 {
      %c0_19 = arith.constant 0 : index
      %c0_20 = arith.constant 0 : index
      %27 = vector.load %arg11[%c0_19, %c0_20] : memref<16x1xf32, #tpu.memory_space<vmem>>, vector<16x1xf32>
      %cst_21 = arith.constant dense<0xFF800000> : vector<16xf32>
      %28 = vector.multi_reduction <maximumf>, %5, %cst_21 [1] : vector<16x16xf32> to vector<16xf32>
      %29 = vector.shape_cast %28 : vector<16xf32> to vector<16x1xf32>
      %30 = arith.maximumf %27, %29 : vector<16x1xf32>
      %31 = vector.broadcast %30 : vector<16x1xf32> to vector<16x16xf32>
      %32 = arith.subf %5, %31 : vector<16x16xf32>
      %33 = math.exp %32 : vector<16x16xf32>
      %34 = arith.subf %27, %30 : vector<16x1xf32>
      %35 = math.exp %34 : vector<16x1xf32>
      %c0_22 = arith.constant 0 : index
      %c0_23 = arith.constant 0 : index
      %36 = vector.load %arg12[%c0_22, %c0_23] : memref<16x1xf32, #tpu.memory_space<vmem>>, vector<16x1xf32>
      %37 = arith.mulf %35, %36 : vector<16x1xf32>
      %cst_24 = arith.constant dense<0.000000e+00> : vector<16xf32>
      %38 = vector.multi_reduction <add>, %33, %cst_24 [1] : vector<16x16xf32> to vector<16xf32>
      %39 = vector.shape_cast %38 : vector<16xf32> to vector<16x1xf32>
      %40 = arith.addf %37, %39 : vector<16x1xf32>
      %c0_25 = arith.constant 0 : index
      %c0_26 = arith.constant 0 : index
      %41 = vector.load %arg12[%c0_25, %c0_26] : memref<16x1xf32, #tpu.memory_space<vmem>>, vector<16x1xf32>
      tpu.vector_store %arg12[%c0_25, %c0_26], %40 {strides = array<i32>} : memref<16x1xf32, #tpu.memory_space<vmem>>, vector<16x1xf32>,
      %c0_27 = arith.constant 0 : index
      %c0_28 = arith.constant 0 : index
      %42 = vector.load %arg11[%c0_27, %c0_28] : memref<16x1xf32, #tpu.memory_space<vmem>>, vector<16x1xf32>
      tpu.vector_store %arg11[%c0_27, %c0_28], %30 {strides = array<i32>} : memref<16x1xf32, #tpu.memory_space<vmem>>, vector<16x1xf32>,
      %cst_29 = arith.constant 0.000000e+00 : f32
      %43 = vector.shape_cast %11 : vector<1x16xf32> to vector<1x16xf32>
      %44 = vector.broadcast %43 : vector<1x16xf32> to vector<16x16xf32>
      %45 = vector.broadcast %cst_29 : f32 to vector<16x16xf32>
      %46 = arith.select %10, %44, %45 : vector<16x16xi1>, vector<16x16xf32>
      %c0_30 = arith.constant 0 : index
      %c0_31 = arith.constant 0 : index
      %47 = vector.load %arg13[%c0_30, %c0_31] : memref<16x1xf32, #tpu.memory_space<vmem>>, vector<16x1xf32>
      %48 = arith.mulf %46, %5 : vector<16x16xf32>
      %cst_32 = arith.constant dense<0.000000e+00> : vector<16xf32>
      %49 = vector.multi_reduction <add>, %48, %cst_32 [1] : vector<16x16xf32> to vector<16xf32>
      %50 = vector.shape_cast %49 : vector<16xf32> to vector<16x1xf32>
      %51 = arith.addf %47, %50 : vector<16x1xf32>
      %c0_33 = arith.constant 0 : index
      %c0_34 = arith.constant 0 : index
      %52 = vector.load %arg13[%c0_33, %c0_34] : memref<16x1xf32, #tpu.memory_space<vmem>>, vector<16x1xf32>
      tpu.vector_store %arg13[%c0_33, %c0_34], %51 {strides = array<i32>} : memref<16x1xf32, #tpu.memory_space<vmem>>, vector<16x1xf32>,
    } else {
    }
    %c0_i32_17 = arith.constant 0 : i32
    %24 = arith.cmpi eq, %arg1, %c0_i32_17 : i32
    %25 = arith.extui %24 : i1 to i32
    %c0_i32_18 = arith.constant 0 : i32
    %26 = arith.cmpi ne, %25, %c0_i32_18 : i32
    scf.if %26 {
      %c0_19 = arith.constant 0 : index
      %c0_20 = arith.constant 0 : index
      %27 = vector.load %arg11[%c0_19, %c0_20] : memref<16x1xf32, #tpu.memory_space<vmem>>, vector<16x1xf32>
      %c0_21 = arith.constant 0 : index
      %c0_22 = arith.constant 0 : index
      %28 = vector.load %arg12[%c0_21, %c0_22] : memref<16x1xf32, #tpu.memory_space<vmem>>, vector<16x1xf32>
      %29 = math.log %28 : vector<16x1xf32>
      %30 = arith.addf %27, %29 : vector<16x1xf32>
      %c0_23 = arith.constant 0 : index
      %c0_24 = arith.constant 0 : index
      %31 = vector.load %arg5[%c0_23, %c0_24] : memref<16x1xf32, #tpu.memory_space<vmem>>, vector<16x1xf32>
      %c0_25 = arith.constant 0 : index
      %c0_26 = arith.constant 0 : index
      %32 = vector.load %arg13[%c0_25, %c0_26] : memref<16x1xf32, #tpu.memory_space<vmem>>, vector<16x1xf32>
      %c0_27 = arith.constant 0 : index
      %c0_28 = arith.constant 0 : index
      %33 = vector.load %arg6[%c0_27, %c0_28] : memref<16x1xf32, #tpu.memory_space<vmem>>, vector<16x1xf32>
      %34 = arith.mulf %30, %33 : vector<16x1xf32>
      %35 = arith.subf %32, %34 : vector<16x1xf32>
      %36 = arith.mulf %31, %35 : vector<16x1xf32>
      %cst_29 = arith.constant dense<0.000000e+00> : vector<1xf32>
      %37 = vector.multi_reduction <add>, %36, %cst_29 [0] : vector<16x1xf32> to vector<1xf32>
      %38 = vector.shape_cast %37 : vector<1xf32> to vector<1x1xf32>
      %39 = vector.shape_cast %38 : vector<1x1xf32> to vector<1x1xf32>
      %40 = vector.broadcast %39 : vector<1x1xf32> to vector<8x128xf32>
      %c0_30 = arith.constant 0 : index
      %c0_31 = arith.constant 0 : index
      %41 = vector.load %arg10[%c0_30, %c0_31] : memref<8x128xf32, #tpu.memory_space<vmem>>, vector<8x128xf32>
      tpu.vector_store %arg10[%c0_30, %c0_31], %40 {strides = array<i32>} : memref<8x128xf32, #tpu.memory_space<vmem>>, vector<8x128xf32>,
    } else {
    }
    return
  }
  func.func @transform_0(%arg0: i32, %arg1: i32) -> (i32, i32) {
    %c0_i32 = arith.constant 0 : i32
    %c0_i32_0 = arith.constant 0 : i32
    return %arg0, %c0_i32 : i32, i32
  }
  func.func @transform_1(%arg0: i32, %arg1: i32) -> (i32, i32) {
    %c0_i32 = arith.constant 0 : i32
    %c0_i32_0 = arith.constant 0 : i32
    return %arg1, %c0_i32 : i32, i32
  }
  func.func @transform_2(%arg0: i32, %arg1: i32) -> (i32, i32) {
    %c0_i32 = arith.constant 0 : i32
    %c0_i32_0 = arith.constant 0 : i32
    return %arg0, %c0_i32 : i32, i32
  }
  func.func @transform_3(%arg0: i32, %arg1: i32) -> (i32, i32) {
    %c0_i32 = arith.constant 0 : i32
    %c0_i32_0 = arith.constant 0 : i32
    return %arg0, %c0_i32 : i32, i32
  }
  func.func @transform_4(%arg0: i32, %arg1: i32) -> (i32, i32) {
    %c0_i32 = arith.constant 0 : i32
    %c0_i32_0 = arith.constant 0 : i32
    return %arg0, %c0_i32 : i32, i32
  }
  func.func @transform_5(%arg0: i32, %arg1: i32) -> (i32, i32) {
    %c0_i32 = arith.constant 0 : i32
    %c0_i32_0 = arith.constant 0 : i32
    return %c0_i32, %arg1 : i32, i32
  }
  func.func @transform_6(%arg0: i32, %arg1: i32) -> (i32, i32) {
    %c0_i32 = arith.constant 0 : i32
    %c0_i32_0 = arith.constant 0 : i32
    return %c0_i32, %arg1 : i32, i32
  }
  func.func @transform_7(%arg0: i32, %arg1: i32) -> (i32, i32) {
    %c0_i32 = arith.constant 0 : i32
    %c0_i32_0 = arith.constant 0 : i32
    return %c0_i32, %arg1 : i32, i32
  }
  func.func @transform_8(%arg0: i32, %arg1: i32) -> (i32, i32) {
    %c0_i32 = arith.constant 0 : i32
    %c0_i32_0 = arith.constant 0 : i32
    return %arg0, %c0_i32 : i32, i32
  }
}

</mosaic_0001>

<bundles_post_ra>
// kernel: _fm_supcon_core.3
= control target key start
LH: loop header
LB: loop body
LE: loop exit
PB: predicated region body
PF: predicated region fallthrough
CT: control target
= control target key end

     0   :  { %vm12_vm0 = vcmask 261120   ;;  %vm49_vm5 = vcmask 257024   ;;  %s90_s0 = inlined_call_operand.vmem [shape: f32[16,32], index: 0, kind: input, shape index: {}]   ;;  %s91_s1 = inlined_call_operand.vmem [shape: bf16[16,32], index: 1, kind: output, shape index: {}]  }
   0x1   :  { %v8_v0 = vld [vmem:[%s90_s0] sm:$0xff]  ;;  %v9_v1 = vld [vmem:[%s90_s0 + $0x8] sm:$0xff] }
   0x2   :  { %v10_v2 = vmul.f32 %v8_v0, %v8_v0  ;;  %v11_v3 = vmul.f32 %v9_v1, %v9_v1 }
   0x4   :  { %v13_v4 = vsel %vm12_vm0, %v10_v2, 0.0  ;;  %v16_v5 = vsel %vm12_vm0, %v11_v3, 0.0 }
   0x5   :  { %14 = vadd.xlane.f32.xlu0 %v13_v4 }
   0x9   :  { %17 = vadd.xlane.f32.xlu0 %v16_v5 }
  0x8e   :  { %v15_v6 = vpop.xlane.xlu0 %14 }
  0x8f   :  { %60 = vrsqrt.f32 %v15_v6  ;;  %vm21_vm1 = vcmp.eq.f32.partialorder %v15_v6, inf  ;;  %v24_v10 = vand.u32 2147483648, %v15_v6  ;;  %vm23_vm2 = vcmp.eq.f32.partialorder %v15_v6, 0.0 }
  0x92   :  { %v18_v7 = vpop.xlane.xlu0 %17 }
  0x93   :  { %62 = vrsqrt.f32 %v18_v7  ;;  %vm28_vm3 = vcmp.eq.f32.partialorder %v18_v7, inf  ;;  %v31_v16 = vand.u32 2147483648, %v18_v7  ;;  %vm30_vm4 = vcmp.eq.f32.partialorder %v18_v7, 0.0 }
  0x9c   :  { %v61_v8 = vpop.eup %60 }
  0x9d   :  { %v20_v9 = vmul.f32 %v61_v8, %v15_v6 }
  0x9f   :  { %v22_v11 = vsel %vm21_vm1, %v15_v6, %v20_v9 }
  0xa0   :  { %v63_v12 = vpop.eup %62  ;;  %v25_v13 = vsel %vm23_vm2, %v24_v10, %v22_v11 }
  0xa1   :  { %v33_v14 = vmax.f32 %v25_v13, 1e-12  ;;  %v27_v15 = vmul.f32 %v63_v12, %v18_v7 }
  0xa3   :  { %64 = vrcp.f32 %v33_v14  ;;  %v29_v17 = vsel %vm28_vm3, %v18_v7, %v27_v15 }
  0xa4   :  { %v32_v18 = vsel %vm30_vm4, %v31_v16, %v29_v17 }
  0xa5   :  { %v34_v19 = vmax.f32 %v32_v18, 1e-12 }
  0xa7   :  { %66 = vrcp.f32 %v34_v19 }
  0xb0   :  { %v65_v20 = vpop.eup %64 }
  0xb1   :  { %v36_v21 = vmul.f32 3.7796447, %v65_v20 }
  0xb3   :  { %v39_v22 = vmul.f32 %v36_v21, %v8_v0 }
  0xb4   :  { %v67_v23 = vpop.eup %66 }
  0xb5   :  { %v58_v24 = vpack.c.bf16 %v39_v22, %v39_v22  ;;  %v38_v25 = vmul.f32 3.7796447, %v67_v23 }
  0xb7   :  { %50 = vst.msk [vmem:[%s91_s1] sm:$0xf] %vm49_vm5, %v58_v24  ;;  %v40_v26 = vmul.f32 %v38_v25, %v9_v1 }
  0xb9   :  { %v59_v27 = vpack.c.bf16 %v40_v26, %v40_v26 }
  0xbb   :  { %51 = vst.msk [vmem:[%s91_s1 + $0x4] sm:$0xf] %vm49_vm5, %v59_v27 }

// kernel: _fm_supcon_core.4
= control target key start
LH: loop header
LB: loop body
LE: loop exit
PB: predicated region body
PF: predicated region fallthrough
CT: control target
= control target key end

     0   :  { %vm12_vm0 = vcmask 130048   ;;  %v56_v2 = vmov 0   ;;  %v25_v10 = vlaneseq  ;;  %vm41_vm2 = vcmask 7168   ;;  %s84_s0 = inlined_call_operand.vmem [shape: f32[8,16], index: 0, kind: input, shape index: {}]   ;;  %s85_s1 = inlined_call_operand.vmem [shape: s32[8,1], index: 1, kind: input, shape index: {}]   ;;  %s86_s2 = inlined_call_operand.vmem [shape: f32[8,1], index: 2, kind: output, shape index: {}]  }
   0x1   :  { %v11_v0 = vld [vmem:[%s84_s0] sm:$0xff]  ;;  %48 = vset.pattern.permute.xlu1 %v56_v2  ;;  %49 = vset.pattern.permute.xlu0 %v56_v2 }
   0x2   :  { %v13_v1 = vsel %vm12_vm0, %v11_v0, -inf  ;;  %v27_v3 = vld [vmem:[%s85_s1] sm:$0xff]  ;;  %v26_v11 = vand.u32 127, %v25_v10 }
   0x3   :  { %14 = vmax.xlane.f32.xlu0 %v13_v1  ;;  %29 = vperm.xlu1 %48, %v27_v3  }
  0x7e   :  { %v30_v12 = vpop.permute.xlu1 %29 }
  0x7f   :  { %vm31_vm1 = vcmp.eq.s32.totalorder %v26_v11, %v30_v12 }
  0x8c   :  { %v15_v4 = vpop.xlane.xlu0 %14 }
  0x8d   :  { %v16_v5 = vsub.f32 %v11_v0, %v15_v4 }
  0x8f   :  { %v17_v6 = vmul.f32 1.442695, %v16_v5 }
  0x91   :  { %50 = vpow2.f32 %v17_v6 }
  0x9e   :  { %v51_v7 = vpop.eup %50 }
  0x9f   :  { %v19_v8 = vsel %vm12_vm0, %v51_v7, 0.0 }
  0xa0   :  { %20 = vadd.xlane.f32.xlu0 %v19_v8 }
 0x129   :  { %v21_v9 = vpop.xlane.xlu0 %20 }
 0x12a   :  { %52 = vlog2.f32 %v21_v9 }
 0x137   :  { %v53_v13 = vpop.eup %52 }
 0x138   :  { %v23_v14 = vmul.f32 0.6931472, %v53_v13 }
 0x13a   :  { %v24_v15 = vsub.f32 %v16_v5, %v23_v14 }
 0x13c   :  { %v32_v16 = vsel %vm31_vm1, %v24_v15, 0.0 }
 0x13d   :  { %v33_v17 = vsel %vm12_vm0, %v32_v16, 0.0 }
 0x13e   :  { %34 = vadd.xlane.f32.xlu1 %v33_v17 }
 0x1c7   :  { %v35_v18 = vpop.xlane.xlu1 %34 }
 0x1c8   :  { %v36_v19 = vmul.f32 1.442695, %v35_v18 }
 0x1ca   :  { %54 = vpow2.f32 %v36_v19 }
 0x1d7   :  { %v55_v20 = vpop.eup %54 }
 0x1d8   :  { %v38_v21 = vsub.f32 1.0, %v55_v20 }
 0x1da   :  { %v39_v22 = vmax.f32 %v38_v21, 0.0 }
 0x1dc   :  { %v40_v23 = vmul.f32 %v39_v22, %v39_v22 }
 0x1de   :  { %42 = vst.msk [vmem:[%s86_s2] sm:$0xff] %vm41_vm2, %v40_v23 }

// kernel: _fm_supcon_core.5
= control target key start
LH: loop header
LB: loop body
LE: loop exit
PB: predicated region body
PF: predicated region fallthrough
CT: control target
= control target key end

     0   :  { %vm55_vm0 = vcmask 261120   ;;  %v373_v0 = vmov 0.0   ;;  %vm374_vm1 = vmmov 0   ;;  %v375_v4 = vmov 0   ;;  %s482_s7 = inlined_call_operand.vmem [shape: f32[1,16], index: 7, kind: input, shape index: {}]   ;;  %s483_s1 = inlined_call_operand.vmem [shape: bf16[16,32], index: 1, kind: input, shape index: {}, may-alias: {0,1}]   ;;  %s484_s0 = inlined_call_operand.vmem [shape: bf16[16,32], index: 0, kind: input, shape index: {}, may-alias: {0,1}]   ;;  %s485_s2 = inlined_call_operand.vmem [shape: s32[16,1], index: 2, kind: input, shape index: {}]   ;;  %s486_s5 = inlined_call_operand.vmem [shape: s32[1,16], index: 5, kind: input, shape index: {}]   ;;  %s487_s6 = inlined_call_operand.vmem [shape: f32[1,16], index: 6, kind: input, shape index: {}]   ;;  %s488_s4 = inlined_call_operand.vmem [shape: f32[16,1], index: 4, kind: input, shape index: {}]   ;;  %s489_s3 = inlined_call_operand.vmem [shape: f32[16,1], index: 3, kind: input, shape index: {}]   ;;  %s490_s8 = inlined_call_operand.vmem [shape: f32[8,128], index: 8, kind: output, shape index: {}]  }
   0x1   :  { %346 = vmatprep.subr.bf16.mxu0 %v373_v0  ;;  %v359_v1 = vld [vmem:[%s483_s1] sm:$0xff]   ;;  %348 = vmatprep.mubr.msk.bf16.mxu0 %vm374_vm1, %v373_v0  ;;  %vm34_vm2 = vcmask 7168   ;;  %v376_v5 = vmov -1e+30   ;;  %v129_v6 = vlaneseq  ;;  %vm149_vm4 = vcmask 130048   ;;  %v104_v27 = vld [vmem:[%s485_s2 + $0x8] sm:$0xff] }
   0x2   :  { %v60_v2 = vsel %vm55_vm0, %v359_v1, 0  ;;  %v360_v3 = vld [vmem:[%s484_s0] sm:$0xff]   ;;  %358 = vset.pattern.permute.xlu0 %v375_v4  ;;  %357 = vset.pattern.permute.xlu1 %v375_v4  ;;  %35 = vst.msk [vmem:[#allocation2] sm:$0xff] %vm34_vm2, %v376_v5  ;;  %36 = vst.msk [vmem:[#allocation2 + $0x8] sm:$0xff] %vm34_vm2, %v376_v5  ;;  %vm377_vm6 = vmmov 1  }
   0x3   :  { %347 = vmatpush3.bf16.xpose.msra.mxu0 %v60_v2  ;;  %37 = vst.msk [vmem:[#allocation3] sm:$0xff] %vm34_vm2, %v373_v0  ;;  %38 = vst.msk [vmem:[#allocation3 + $0x8] sm:$0xff] %vm34_vm2, %v373_v0  ;;  %v130_v7 = vshrl.u32 %v129_v6, 7  ;;  %v136_v8 = vand.u32 127, %v129_v6  ;;  %v103_v18 = vld [vmem:[%s485_s2] sm:$0xff] }
   0x4   :  { %39 = vst.msk [vmem:[#allocation4] sm:$0xff] %vm34_vm2, %v373_v0  ;;  %40 = vst.msk [vmem:[#allocation4 + $0x8] sm:$0xff] %vm34_vm2, %v373_v0  ;;  %v342_v28 = vld [vmem:[%s486_s5] ss:$0 sm:$0xff] }
   0x5   :  { %vm139_vm3 = vcmp.eq.s32.totalorder %v130_v7, %v136_v8  ;;  %v131_v9 = vadd.s32 8, %v130_v7  ;;  %v343_v29 = vld [vmem:[%s487_s6] ss:$0 sm:$0xff] }
   0x6   :  { %vm143_vm7 = vmxor %vm139_vm3, %vm377_vm6  ;;  %v311_v7 = vld [vmem:[%s488_s4] sm:$0xff] }
   0x7   :  { %vm140_vm5 = vcmp.eq.s32.totalorder %v131_v9, %v136_v8 }
   0x8   :  { %vm144_vm10 = vmxor %vm140_vm5, %vm377_vm6 }
   0x9   :  { %v147_v19 = vld [vmem:[#allocation2] sm:$0xff]  ;;  %v148_v22 = vld [vmem:[#allocation2 + $0x8] sm:$0xff] }
   0xa   :  { %349 = vmatmul.mubr.msk.bf16.vlgmr.msra.gmra.mxu0 %vm55_vm0, %v360_v3  ;;  %v180_v54 = vld [vmem:[#allocation3] sm:$0xff]  ;;  %v181_v58 = vld [vmem:[#allocation3 + $0x8] sm:$0xff] }
   0xb   :  { %v205_v48 = vld [vmem:[#allocation4] sm:$0xff]  ;;  %v206_v63 = vld [vmem:[#allocation4 + $0x8] sm:$0xff] }
  0xca   :  { %v96_v10 = vpop.f32.mrf.mxu0 }
  0xcb   :  { %v141_v11 = vsel %vm139_vm3, -1e+30, %v96_v10 }
  0xcc   :  { %v350_v12 = vpop.f32.mrf.mxu0  ;;  %v150_v13 = vsel %vm149_vm4, %v141_v11, -inf }
  0xcd   :  { %151 = vmax.xlane.f32.xlu0 %v150_v13 }
  0xce   :  { %v99_v14 = vpop.f32.mrf.mxu0 }
  0xcf   :  { %v142_v15 = vsel %vm140_vm5, -1e+30, %v99_v14 }
  0xd0   :  { %v351_v16 = vpop.f32.mrf.mxu0  ;;  %v153_v17 = vsel %vm149_vm4, %v142_v15, -inf }
  0xd1   :  { %154 = vmax.xlane.f32.xlu0 %v153_v17  ;;  %v307_v17 = vld [vmem:[%s489_s3] sm:$0xff] }
  0xe7   :  { %107 = vperm.xlu0 %358, %v103_v18  }
 0x156   :  { %v152_v20 = vpop.xlane.xlu0 %151 }
 0x157   :  { %v156_v21 = vmax.f32 %v147_v19, %v152_v20 }
 0x159   :  { %v174_v23 = vsub.f32 %v147_v19, %v156_v21  ;;  %195 = vst.msk [vmem:[#allocation2] sm:$0xff] %vm34_vm2, %v156_v21  ;;  %160 = vperm.xlu1 %357, %v156_v21   ;;  %v308_v19 = vld [vmem:[%s489_s3 + $0x8] sm:$0xff] }
 0x15a   :  { %v155_v24 = vpop.xlane.xlu0 %154 }
 0x15b   :  { %v157_v25 = vmax.f32 %v148_v22, %v155_v24  ;;  %v176_v51 = vmul.f32 1.442695, %v174_v23 }
 0x15d   :  { %v175_v26 = vsub.f32 %v148_v22, %v157_v25  ;;  %196 = vst.msk [vmem:[#allocation2 + $0x8] sm:$0xff] %vm34_vm2, %v157_v25  ;;  %165 = vperm.xlu1 %357, %v157_v25  }
 0x15f   :  { %v178_v52 = vmul.f32 1.442695, %v175_v26 }
 0x160   :  { %v297_v6 = vld [vmem:[#allocation2] sm:$0xff] }
 0x161   :  { %110 = vperm.xlu1 %357, %v104_v27  }
 0x162   :  { %v108_v30 = vpop.permute.xlu0 %107 }
 0x163   :  { %vm116_vm8 = vcmp.eq.s32.totalorder %v108_v30, %v342_v28 }
 0x164   :  { %vm145_vm9 = vmand %vm116_vm8, %vm143_vm7  ;;  %v298_v12 = vld [vmem:[#allocation2 + $0x8] sm:$0xff] }
 0x165   :  { %v203_v31 = vsel %vm145_vm9, %v343_v29, 0.0 }
 0x166   :  { %v207_v32 = vmul.f32 %v203_v31, %v96_v10 }
 0x168   :  { %v209_v33 = vsel %vm149_vm4, %v207_v32, 0.0 }
 0x169   :  { %210 = vadd.xlane.f32.xlu0 %v209_v33 }
 0x1d4   :  { %v161_v34 = vpop.permute.xlu1 %160 }
 0x1d5   :  { %v168_v35 = vsub.f32 %v141_v11, %v161_v34 }
 0x1d7   :  { %v170_v36 = vmul.f32 1.442695, %v168_v35 }
 0x1d8   :  { %v166_v37 = vpop.permute.xlu1 %165 }
 0x1d9   :  { %361 = vpow2.f32 %v170_v36  ;;  %v169_v38 = vsub.f32 %v142_v15, %v166_v37 }
 0x1db   :  { %v172_v39 = vmul.f32 1.442695, %v169_v38 }
 0x1dc   :  { %v111_v40 = vpop.permute.xlu1 %110 }
 0x1dd   :  { %363 = vpow2.f32 %v172_v39  ;;  %vm117_vm11 = vcmp.eq.s32.totalorder %v111_v40, %v342_v28 }
 0x1de   :  { %vm146_vm12 = vmand %vm117_vm11, %vm144_vm10  ;;  %365 = vpow2.f32 %v176_v51 }
 0x1df   :  { %v204_v43 = vsel %vm146_vm12, %v343_v29, 0.0  ;;  %367 = vpow2.f32 %v178_v52 }
 0x1e0   :  { %v208_v46 = vmul.f32 %v204_v43, %v99_v14  ;;  %v312_v14 = vld [vmem:[%s488_s4 + $0x8] sm:$0xff] }
 0x1e2   :  { %v212_v47 = vsel %vm149_vm4, %v208_v46, 0.0 }
 0x1e6   :  { %v362_v41 = vpop.eup %361 }
 0x1e7   :  { %v184_v42 = vsel %vm149_vm4, %v362_v41, 0.0 }
 0x1e8   :  { %185 = vadd.xlane.f32.xlu1 %v184_v42 }
 0x1ea   :  { %v364_v44 = vpop.eup %363 }
 0x1eb   :  { %v187_v45 = vsel %vm149_vm4, %v364_v44, 0.0  ;;  %v366_v53 = vpop.eup %365 }
 0x1ec   :  { %188 = vadd.xlane.f32.xlu1 %v187_v45  ;;  %v182_v55 = vmul.f32 %v366_v53, %v180_v54  ;;  %v368_v56 = vpop.eup %367 }
 0x1ed   :  { %v183_v60 = vmul.f32 %v368_v56, %v181_v58 }
 0x1f0   :  { %213 = vadd.xlane.f32.xlu1 %v212_v47 }
 0x1f2   :  { %v211_v49 = vpop.xlane.xlu0 %210 }
 0x1f3   :  { %v215_v50 = vadd.f32 %v211_v49, %v205_v48 }
 0x1f5   :  { %217 = vst.msk [vmem:[#allocation4] sm:$0xff] %vm34_vm2, %v215_v50 }
 0x1fc   :  { %v309_v13 = vld [vmem:[#allocation4] sm:$0xff] }
 0x271   :  { %v186_v57 = vpop.xlane.xlu1 %185 }
 0x272   :  { %v190_v59 = vadd.f32 %v186_v57, %v182_v55 }
 0x274   :  { %193 = vst.msk [vmem:[#allocation3] sm:$0xff] %vm34_vm2, %v190_v59 }
 0x275   :  { %v189_v61 = vpop.xlane.xlu1 %188 }
 0x276   :  { %v191_v62 = vadd.f32 %v189_v61, %v183_v60 }
 0x278   :  { %194 = vst.msk [vmem:[#allocation3 + $0x8] sm:$0xff] %vm34_vm2, %v191_v62 }
 0x279   :  { %v214_v0 = vpop.xlane.xlu1 %213 }
 0x27a   :  { %v216_v1 = vadd.f32 %v214_v0, %v206_v63 }
 0x27b   :  { %v299_v2 = vld [vmem:[#allocation3] sm:$0xff] }
 0x27c   :  { %218 = vst.msk [vmem:[#allocation4 + $0x8] sm:$0xff] %vm34_vm2, %v216_v1  ;;  %369 = vlog2.f32 %v299_v2 }
 0x27f   :  { %v300_v3 = vld [vmem:[#allocation3 + $0x8] sm:$0xff] }
 0x280   :  { %371 = vlog2.f32 %v300_v3 }
 0x283   :  { %v310_v20 = vld [vmem:[#allocation4 + $0x8] sm:$0xff] }
 0x289   :  { %v370_v4 = vpop.eup %369 }
 0x28a   :  { %v302_v5 = vmul.f32 0.6931472, %v370_v4 }
 0x28c   :  { %v305_v8 = vadd.f32 %v302_v5, %v297_v6 }
 0x28d   :  { %v372_v9 = vpop.eup %371 }
 0x28e   :  { %v304_v10 = vmul.f32 0.6931472, %v372_v9  ;;  %v313_v11 = vmul.f32 %v311_v7, %v305_v8 }
 0x290   :  { %v306_v15 = vadd.f32 %v304_v10, %v298_v12  ;;  %v315_v16 = vsub.f32 %v309_v13, %v313_v11 }
 0x292   :  { %v314_v18 = vmul.f32 %v312_v14, %v306_v15  ;;  %v317_v22 = vmul.f32 %v315_v16, %v307_v17 }
 0x294   :  { %v316_v21 = vsub.f32 %v310_v20, %v314_v18  ;;  %v320_v24 = vsel %vm34_vm2, %v317_v22, 0.0 }
 0x296   :  { %v318_v23 = vmul.f32 %v316_v21, %v308_v19 }
 0x298   :  { %v321_v25 = vsel %vm34_vm2, %v318_v23, 0.0 }
 0x299   :  { %v322_v26 = vadd.f32 %v321_v25, %v320_v24 }
 0x29b   :  { %v323_v27 = vrot.slane %v322_v26, 4 }
 0x29d   :  { %v324_v28 = vadd.f32 %v323_v27, %v322_v26 }
 0x29f   :  { %v325_v29 = vrot.slane %v324_v28, 2 }
 0x2a1   :  { %v326_v30 = vadd.f32 %v325_v29, %v324_v28 }
 0x2a3   :  { %v327_v31 = vrot.slane %v326_v30, 1 }
 0x2a5   :  { %v328_v32 = vadd.f32 %v327_v31, %v326_v30 }
 0x2a7   :  { %331 = vperm.xlu1 %357, %v328_v32  }
 0x322   :  { %v332_v33 = vpop.permute.xlu1 %331 }
 0x323   :  { %334 = vst [vmem:[%s490_s8] sm:$0xff] %v332_v33 }

</bundles_post_ra>
